<compile_context>
chip_gen: v5e
topology: v5e:2x2
jax: 0.10.0
libtpu: 0.0.40
codegen_flags: <defaults>
</compile_context>

<pallas_src>
import math
import jax
import jax.numpy as jnp
from jax.experimental import pallas as pl
from jax.experimental.pallas import tpu as pltpu


def _silu(v):
    return v * jax.nn.sigmoid(v)


def diffusion_mlp_kernel(steps_ref, table_ref, w1_ref, b1_ref, w2_ref, b2_ref, o_ref):
    # steps_ref: VMEM (B, 1) int32   diffusion step indices
    # table_ref: VMEM (T, E) f32     sin/cos embedding table
    # w1_ref:    VMEM (E, P) f32     projection1 weight (transposed vs PyTorch)
    # b1_ref:    VMEM (1, P) f32
    # w2_ref:    VMEM (P, P) f32     projection2 weight (transposed vs PyTorch)
    # b2_ref:    VMEM (1, P) f32
    # o_ref:     VMEM (B, P) f32
    B = steps_ref.shape[0]
    T = table_ref.shape[0]

    # One-hot gather on the MXU: no data-dependent addressing, no scratch.
    steps = jnp.clip(steps_ref[...], 0, T - 1)                     # (B, 1) int32
    col_ids = jax.lax.broadcasted_iota(jnp.int32, (B, T), 1)       # (B, T)
    onehot = (col_ids == steps).astype(jnp.float32)                # (B, T)
    x = jnp.dot(onehot, table_ref[...], preferred_element_type=jnp.float32)  # (B, E)

    h = jnp.dot(x, w1_ref[...], preferred_element_type=jnp.float32) + b1_ref[...]
    h = _silu(h)
    y = jnp.dot(h, w2_ref[...], preferred_element_type=jnp.float32) + b2_ref[...]
    o_ref[...] = _silu(y).astype(o_ref.dtype)


def build_embedding(num_steps: int, dim: int) -> jnp.ndarray:
    """Port of DiffusionEmbedding._build_embedding (dim = embedding_dim / 2)."""
    steps = jnp.arange(num_steps, dtype=jnp.float32)[:, None]                        # (T, 1)
    freqs = 10.0 ** (jnp.arange(dim, dtype=jnp.float32) / (dim - 1) * 4.0)[None, :]  # (1, dim)
    table = steps * freqs                                                            # (T, dim)
    return jnp.concatenate([jnp.sin(table), jnp.cos(table)], axis=1)                 # (T, 2*dim)


def init_params(key, embedding_dim: int, projection_dim: int):
    """Deterministic nn.Linear-style init (uniform in +/- 1/sqrt(fan_in))."""
    k1, k2, k3, k4 = jax.random.split(key, 4)
    bound1 = 1.0 / math.sqrt(embedding_dim)
    bound2 = 1.0 / math.sqrt(projection_dim)
    # Stored as (in, out) so the kernel does x @ W (== PyTorch x @ W^T).
    w1 = jax.random.uniform(k1, (embedding_dim, projection_dim), jnp.float32, -bound1, bound1)
    b1 = jax.random.uniform(k2, (1, projection_dim), jnp.float32, -bound1, bound1)
    w2 = jax.random.uniform(k3, (projection_dim, projection_dim), jnp.float32, -bound2, bound2)
    b2 = jax.random.uniform(k4, (1, projection_dim), jnp.float32, -bound2, bound2)
    return w1, b1, w2, b2


def diffusion_embedding_forward(diffusion_step, embedding_table, w1, b1, w2, b2):
    """Fused forward pass: one-hot gather + projection1 + SiLU + projection2 + SiLU."""
    B = diffusion_step.shape[0]
    T, E = embedding_table.shape
    P = w1.shape[1]

    steps_2d = diffusion_step.astype(jnp.int32).reshape(B, 1)

    full = lambda shape: pl.BlockSpec(shape, lambda i: tuple(0 for _ in shape))

    # Advisory cost hint: this custom call is microscopic.
    flops = 2 * B * T * E + 2 * B * E * P + 2 * B * P * P
    transcendentals = 2 * B * P  # two SiLUs -> two sigmoids per output element
    bytes_accessed = 4 * (B + T * E + E * P + P + P * P + P + B * P)

    out = pl.pallas_call(
        diffusion_mlp_kernel,
        out_shape=jax.ShapeDtypeStruct((B, P), jnp.float32),
        grid=(1,),
        in_specs=[
            full((B, 1)),   # step indices
            full((T, E)),   # embedding table
            full((E, P)),   # w1
            full((1, P)),   # b1
            full((P, P)),   # w2
            full((1, P)),   # b2
        ],
        out_specs=full((B, P)),
        compiler_params=pltpu.CompilerParams(
            dimension_semantics=("arbitrary",),
            vmem_limit_bytes=2 * 1024 * 1024,
        ),
        cost_estimate=pl.CostEstimate(
            flops=flops,
            transcendentals=transcendentals,
            bytes_accessed=bytes_accessed,
        ),
    )(steps_2d, embedding_table, w1, b1, w2, b2)
    return out


def reference_forward(diffusion_step, embedding_table, w1, b1, w2, b2):
    x = jnp.take(embedding_table, diffusion_step, axis=0)
    x = _silu(x @ w1 + b1)
    x = _silu(x @ w2 + b2)
    return x


if __name__ == "__main__":
    num_steps = 50
    embedding_dim = 128
    projection_dim = 128
    batch = 8

    key = jax.random.PRNGKey(0)
    k_params, k_steps = jax.random.split(key)

    embedding_table = build_embedding(num_steps, embedding_dim // 2)  # (50, 128)
    w1, b1, w2, b2 = init_params(k_params, embedding_dim, projection_dim)

    diffusion_step = jax.random.randint(k_steps, (batch,), 0, num_steps, dtype=jnp.int32)

    out = diffusion_embedding_forward(diffusion_step, embedding_table, w1, b1, w2, b2)
    out = jax.block_until_ready(out)

    ref = reference_forward(diffusion_step, embedding_table, w1, b1, w2, b2)
    assert out.shape == (batch, projection_dim)
    assert jnp.allclose(out, ref, atol=1e-5, rtol=1e-5), "mismatch vs pure-JAX reference"

    print("KERNEL_OK")
</pallas_src>

<mosaic_0001>
module attributes {stable_mosaic.version = 11 : i64} {
  func.func @diffusion_mlp_kernel(%arg0: i32, %arg1: memref<8x1xi32, #tpu.memory_space<vmem>>, %arg2: memref<50x128xf32, #tpu.memory_space<vmem>>, %arg3: memref<128x128xf32, #tpu.memory_space<vmem>>, %arg4: memref<1x128xf32, #tpu.memory_space<vmem>>, %arg5: memref<128x128xf32, #tpu.memory_space<vmem>>, %arg6: memref<1x128xf32, #tpu.memory_space<vmem>>, %arg7: memref<8x128xf32, #tpu.memory_space<vmem>>) attributes {dimension_semantics = [#tpu.dimension_semantics<arbitrary>], iteration_bounds = array<i64: 1>, scalar_prefetch = 0 : i64, scratch_operands = 0 : i64, tpu.core_type = #tpu.core_type<tc>, window_params = [{pipeline_mode = #tpu.pipeline_mode<synchronous>, transform_indices = @transform_0, window_bounds = array<i64: 8, 1>}, {pipeline_mode = #tpu.pipeline_mode<synchronous>, transform_indices = @transform_1, window_bounds = array<i64: 50, 128>}, {pipeline_mode = #tpu.pipeline_mode<synchronous>, transform_indices = @transform_2, window_bounds = array<i64: 128, 128>}, {pipeline_mode = #tpu.pipeline_mode<synchronous>, transform_indices = @transform_3, window_bounds = array<i64: 1, 128>}, {pipeline_mode = #tpu.pipeline_mode<synchronous>, transform_indices = @transform_4, window_bounds = array<i64: 128, 128>}, {pipeline_mode = #tpu.pipeline_mode<synchronous>, transform_indices = @transform_5, window_bounds = array<i64: 1, 128>}, {pipeline_mode = #tpu.pipeline_mode<synchronous>, transform_indices = @transform_6, window_bounds = array<i64: 8, 128>}]} {
    %c0 = arith.constant 0 : index
    %c0_0 = arith.constant 0 : index
    %0 = vector.load %arg1[%c0, %c0_0] : memref<8x1xi32, #tpu.memory_space<vmem>>, vector<8x1xi32>
    %c0_i32 = arith.constant 0 : i32
    %c49_i32 = arith.constant 49 : i32
    %1 = vector.broadcast %c0_i32 : i32 to vector<8x1xi32>
    %2 = arith.maxsi %1, %0 : vector<8x1xi32>
    %3 = vector.broadcast %c49_i32 : i32 to vector<8x1xi32>
    %4 = arith.minsi %3, %2 : vector<8x1xi32>
    %5 = tpu.iota {dimensions = array<i32: 1>} : vector<8x50xi32>
    %6 = vector.broadcast %4 : vector<8x1xi32> to vector<8x50xi32>
    %7 = arith.cmpi eq, %5, %6 : vector<8x50xi32>
    %8 = arith.extui %7 : vector<8x50xi1> to vector<8x50xi32>
    %9 = arith.sitofp %8 : vector<8x50xi32> to vector<8x50xf32>
    %c0_1 = arith.constant 0 : index
    %c0_2 = arith.constant 0 : index
    %10 = vector.load %arg2[%c0_1, %c0_2] : memref<50x128xf32, #tpu.memory_space<vmem>>, vector<50x128xf32>
    %cst = arith.constant dense<0.000000e+00> : vector<8x128xf32>
    %11 = tpu.matmul %9, %10, %cst {dimension_numbers = #tpu.dot_dimension_numbers<[1], [0], [0], [1], [0, 0, 1, 1], [], []>} : vector<8x50xf32>, vector<50x128xf32>, vector<8x128xf32> -> vector<8x128xf32>
    %c0_3 = arith.constant 0 : index
    %c0_4 = arith.constant 0 : index
    %12 = vector.load %arg3[%c0_3, %c0_4] : memref<128x128xf32, #tpu.memory_space<vmem>>, vector<128x128xf32>
    %cst_5 = arith.constant dense<0.000000e+00> : vector<8x128xf32>
    %13 = tpu.matmul %11, %12, %cst_5 {dimension_numbers = #tpu.dot_dimension_numbers<[1], [0], [0], [1], [0, 0, 1, 1], [], []>} : vector<8x128xf32>, vector<128x128xf32>, vector<8x128xf32> -> vector<8x128xf32>
    %c0_6 = arith.constant 0 : index
    %c0_7 = arith.constant 0 : index
    %14 = vector.load %arg4[%c0_6, %c0_7] : memref<1x128xf32, #tpu.memory_space<vmem>>, vector<1x128xf32>
    %15 = vector.broadcast %14 : vector<1x128xf32> to vector<8x128xf32>
    %16 = arith.addf %13, %15 : vector<8x128xf32>
    %17 = arith.negf %16 : vector<8x128xf32>
    %18 = math.exp %17 : vector<8x128xf32>
    %cst_8 = arith.constant 1.000000e+00 : f32
    %19 = vector.broadcast %cst_8 : f32 to vector<8x128xf32>
    %20 = arith.addf %19, %18 : vector<8x128xf32>
    %21 = arith.divf %19, %20 : vector<8x128xf32>
    %22 = arith.mulf %16, %21 : vector<8x128xf32>
    %c0_9 = arith.constant 0 : index
    %c0_10 = arith.constant 0 : index
    %23 = vector.load %arg5[%c0_9, %c0_10] : memref<128x128xf32, #tpu.memory_space<vmem>>, vector<128x128xf32>
    %cst_11 = arith.constant dense<0.000000e+00> : vector<8x128xf32>
    %24 = tpu.matmul %22, %23, %cst_11 {dimension_numbers = #tpu.dot_dimension_numbers<[1], [0], [0], [1], [0, 0, 1, 1], [], []>} : vector<8x128xf32>, vector<128x128xf32>, vector<8x128xf32> -> vector<8x128xf32>
    %c0_12 = arith.constant 0 : index
    %c0_13 = arith.constant 0 : index
    %25 = vector.load %arg6[%c0_12, %c0_13] : memref<1x128xf32, #tpu.memory_space<vmem>>, vector<1x128xf32>
    %26 = vector.broadcast %25 : vector<1x128xf32> to vector<8x128xf32>
    %27 = arith.addf %24, %26 : vector<8x128xf32>
    %28 = arith.negf %27 : vector<8x128xf32>
    %29 = math.exp %28 : vector<8x128xf32>
    %cst_14 = arith.constant 1.000000e+00 : f32
    %30 = vector.broadcast %cst_14 : f32 to vector<8x128xf32>
    %31 = arith.addf %30, %29 : vector<8x128xf32>
    %32 = arith.divf %30, %31 : vector<8x128xf32>
    %33 = arith.mulf %27, %32 : vector<8x128xf32>
    %c0_15 = arith.constant 0 : index
    %c0_16 = arith.constant 0 : index
    %34 = vector.load %arg7[%c0_15, %c0_16] : memref<8x128xf32, #tpu.memory_space<vmem>>, vector<8x128xf32>
    tpu.vector_store %arg7[%c0_15, %c0_16], %33 {strides = array<i32>} : memref<8x128xf32, #tpu.memory_space<vmem>>, vector<8x128xf32>,
    return
  }
  func.func @transform_0(%arg0: i32) -> (i32, i32) {
    %c0_i32 = arith.constant 0 : i32
    %c0_i32_0 = arith.constant 0 : i32
    %c0_i32_1 = arith.constant 0 : i32
    return %c0_i32, %c0_i32_0 : i32, i32
  }
  func.func @transform_1(%arg0: i32) -> (i32, i32) {
    %c0_i32 = arith.constant 0 : i32
    %c0_i32_0 = arith.constant 0 : i32
    %c0_i32_1 = arith.constant 0 : i32
    return %c0_i32, %c0_i32_0 : i32, i32
  }
  func.func @transform_2(%arg0: i32) -> (i32, i32) {
    %c0_i32 = arith.constant 0 : i32
    %c0_i32_0 = arith.constant 0 : i32
    %c0_i32_1 = arith.constant 0 : i32
    return %c0_i32, %c0_i32_0 : i32, i32
  }
  func.func @transform_3(%arg0: i32) -> (i32, i32) {
    %c0_i32 = arith.constant 0 : i32
    %c0_i32_0 = arith.constant 0 : i32
    %c0_i32_1 = arith.constant 0 : i32
    return %c0_i32, %c0_i32_0 : i32, i32
  }
  func.func @transform_4(%arg0: i32) -> (i32, i32) {
    %c0_i32 = arith.constant 0 : i32
    %c0_i32_0 = arith.constant 0 : i32
    %c0_i32_1 = arith.constant 0 : i32
    return %c0_i32, %c0_i32_0 : i32, i32
  }
  func.func @transform_5(%arg0: i32) -> (i32, i32) {
    %c0_i32 = arith.constant 0 : i32
    %c0_i32_0 = arith.constant 0 : i32
    %c0_i32_1 = arith.constant 0 : i32
    return %c0_i32, %c0_i32_0 : i32, i32
  }
  func.func @transform_6(%arg0: i32) -> (i32, i32) {
    %c0_i32 = arith.constant 0 : i32
    %c0_i32_0 = arith.constant 0 : i32
    %c0_i32_1 = arith.constant 0 : i32
    return %c0_i32, %c0_i32_0 : i32, i32
  }
}

</mosaic_0001>

<bundles_post_ra>
// kernel: tpu_custom_call.1
= control target key start
LH: loop header
LB: loop body
LE: loop exit
PB: predicated region body
PF: predicated region fallthrough
CT: control target
= control target key end

     0   :  { %11 = vsyncpa [#allocation3], 0  ;;  %s448_s0 = inlined_call_operand.vmem [shape: s32[8,1], index: 0, kind: input, shape index: {}]   ;;  %s449_s1 = inlined_call_operand.hbm [shape: f32[50,128], index: 1, kind: input, shape index: {}]   ;;  %s450_s2 = inlined_call_operand.hbm [shape: f32[128,128], index: 2, kind: input, shape index: {}]   ;;  %s451_s3 = inlined_call_operand.vmem [shape: f32[1,128], index: 3, kind: input, shape index: {}]   ;;  %s452_s4 = inlined_call_operand.hbm [shape: f32[128,128], index: 4, kind: input, shape index: {}]   ;;  %s453_s5 = inlined_call_operand.vmem [shape: f32[1,128], index: 5, kind: input, shape index: {}]   ;;  %s454_s6 = inlined_call_operand.hbm [shape: f32[8,128], index: 6, kind: output, shape index: {}]  }
   0x1   :  { %12 = vsyncpa [#allocation6], 0 }
   0x2   :  { %13 = vsyncpa [#allocation4], 0  ;;  %s33_s23 = sshll.u32 %s450_s2, 4  ;;  %s384_s24 = smov [#allocation5]   ;;  %s34_s23 = int_to_ptr.hbm [resolvable:$true] %s33_s23 }
   0x3   :  { %s35_s25 = sshll.u32 %s384_s24, 4  ;;  %s20_s28 = sshll.u32 %s449_s1, 4  ;;  %s36_s25 = int_to_ptr.vmem [resolvable:$true] %s35_s25  ;;  %s21_s28 = int_to_ptr.hbm [resolvable:$true] %s20_s28 }
   0x4   :  { %s385_s29 = smov 128   ;;  %s386_s30 = smov 8  }
   0x5   :  { %41 = dma.hbm_to_vmem [thread:$0]  %s34_s23, 2048, %s36_s25, [#allocation6], %s385_s29, %s385_s29, %s386_s30  }
   0x6   :  { %s387_s7 = smov [#allocation2]   ;;  %s48_s11 = sshll.u32 %s452_s4, 4  ;;  %s49_s11 = int_to_ptr.hbm [resolvable:$true] %s48_s11 }
   0x7   :  { %s22_s8 = sshll.u32 %s387_s7, 4  ;;  %s388_s2 = smov [#allocation7]   ;;  %s23_s8 = int_to_ptr.vmem [resolvable:$true] %s22_s8 }
   0x8   :  { %28 = dma.hbm_to_vmem [thread:$0]  %s21_s28, 896, %s23_s8, [#allocation3], %s385_s29, %s385_s29, %s386_s30  }
   0x9   :  { %s50_s12 = sshll.u32 %s388_s2, 4  ;;  %s51_s12 = int_to_ptr.vmem [resolvable:$true] %s50_s12 }
   0xa   :  { %56 = dma.hbm_to_vmem [thread:$0]  %s49_s11, 2048, %s51_s12, [#allocation6], %s385_s29, %s385_s29, %s386_s30  }
   0xb   :  { %378 = dma.done.wait [#allocation3], 896  }
   0xc   :  { %379 = vsyncadd [#allocation3], 4294966400 }
   0xd   :  { %380 = dma.done.wait [#allocation6], 4096  }
   0xe   :  { %381 = vsyncadd [#allocation6], 4294963200  ;;  %v389_v0 = vmov 0   ;;  %vm95_vm0 = vcmask 1041408   ;;  %v71_v1 = vld [vmem:[%s448_s0] sm:$0xff]  ;;  %v89_v3 = vld [vmem:[#allocation2 + $0x28] sm:$0xff]  ;;  %v76_v23 = vlaneseq }
   0xf   :  { %271 = vset.pattern.permute.xlu0 %v389_v0  ;;  %v90_v2 = vld [vmem:[#allocation2 + $0x30] sm:$0x3]  ;;  %vm72_vm1 = vcmp.gt.s32.totalorder %v71_v1, 0  ;;  %v88_v5 = vld [vmem:[#allocation2 + $0x20] sm:$0xff]  ;;  %v87_v7 = vld [vmem:[#allocation2 + $0x18] sm:$0xff]  ;;  %vm91_vm3 = vcmask 408576  }
  0x10   :  { %259 = vmatpush.msk.msra.mxu0 %vm95_vm0, %v90_v2  ;;  %v73_v4 = vsel %vm72_vm1, %v71_v1, 0  ;;  %v86_v8 = vld [vmem:[#allocation2 + $0x10] sm:$0xff]  ;;  %v85_v9 = vld [vmem:[#allocation2 + $0x8] sm:$0xff]  ;;  %v84_v10 = vld [vmem:[#allocation2] sm:$0xff]  ;;  %v77_v26 = vand.u32 127, %v76_v23  ;;  %v390_v29 = vmov 0.0  }
  0x11   :  { %vm74_vm2 = vcmp.lt.s32.totalorder %v73_v4, 49  ;;  %v134_v11 = vld [vmem:[#allocation5 + $0x78] sm:$0xff]  ;;  %v133_v12 = vld [vmem:[#allocation5 + $0x70] sm:$0xff]  ;;  %v132_v13 = vld [vmem:[#allocation5 + $0x68] sm:$0xff]  ;;  %s391_s15 = smov [#allocation8]   ;;  %s247_s18 = sshll.u32 %s454_s6, 4  ;;  %s248_s18 = int_to_ptr.hbm [resolvable:$true] %s247_s18 }
  0x12   :  { %109 = vmatpush.msra.mxu0 %v89_v3  ;;  %v75_v6 = vsel %vm74_vm2, %v73_v4, 49  ;;  %139 = vmatpush.msra.mxu1 %v134_v11  ;;  %v131_v14 = vld [vmem:[#allocation5 + $0x60] sm:$0xff]  ;;  %v130_v15 = vld [vmem:[#allocation5 + $0x58] sm:$0xff]  ;;  %v129_v16 = vld [vmem:[#allocation5 + $0x50] sm:$0xff] }
  0x13   :  { %79 = vperm.xlu0 %271, %v75_v6   ;;  %v128_v17 = vld [vmem:[#allocation5 + $0x48] sm:$0xff]  ;;  %v127_v18 = vld [vmem:[#allocation5 + $0x40] sm:$0xff]  ;;  %v126_v19 = vld [vmem:[#allocation5 + $0x38] sm:$0xff] }
  0x14   :  { %110 = vmatpush.msra.mxu0 %v88_v5  ;;  %140 = vmatpush.msra.mxu1 %v133_v12  ;;  %v125_v20 = vld [vmem:[#allocation5 + $0x30] sm:$0xff]  ;;  %v124_v21 = vld [vmem:[#allocation5 + $0x28] sm:$0xff]  ;;  %v123_v22 = vld [vmem:[#allocation5 + $0x20] sm:$0xff] }
  0x15   :  { %v122_v24 = vld [vmem:[#allocation5 + $0x18] sm:$0xff]  ;;  %v121_v25 = vld [vmem:[#allocation5 + $0x10] sm:$0xff]  ;;  %v120_v27 = vld [vmem:[#allocation5 + $0x8] sm:$0xff] }
  0x16   :  { %111 = vmatpush.msra.mxu0 %v87_v7  ;;  %141 = vmatpush.msra.mxu1 %v132_v13  ;;  %v119_v31 = vld [vmem:[#allocation5] sm:$0xff]  ;;  %v194_v33 = vld [vmem:[#allocation7 + $0x78] sm:$0xff]  ;;  %v193_v34 = vld [vmem:[#allocation7 + $0x70] sm:$0xff] }
  0x17   :  { %199 = vmatpush.msra.mxu2 %v194_v33  ;;  %v192_v35 = vld [vmem:[#allocation7 + $0x68] sm:$0xff]  ;;  %v191_v36 = vld [vmem:[#allocation7 + $0x60] sm:$0xff]  ;;  %v190_v37 = vld [vmem:[#allocation7 + $0x58] sm:$0xff] }
  0x18   :  { %112 = vmatpush.msra.mxu0 %v86_v8  ;;  %142 = vmatpush.msra.mxu1 %v131_v14  ;;  %v189_v38 = vld [vmem:[#allocation7 + $0x50] sm:$0xff]  ;;  %v188_v39 = vld [vmem:[#allocation7 + $0x48] sm:$0xff]  ;;  %v187_v40 = vld [vmem:[#allocation7 + $0x40] sm:$0xff] }
  0x19   :  { %200 = vmatpush.msra.mxu2 %v193_v34  ;;  %v186_v41 = vld [vmem:[#allocation7 + $0x38] sm:$0xff]  ;;  %v185_v42 = vld [vmem:[#allocation7 + $0x30] sm:$0xff]  ;;  %v184_v43 = vld [vmem:[#allocation7 + $0x28] sm:$0xff] }
  0x1a   :  { %113 = vmatpush.msra.mxu0 %v85_v9  ;;  %143 = vmatpush.msra.mxu1 %v130_v15  ;;  %v183_v44 = vld [vmem:[#allocation7 + $0x20] sm:$0xff]  ;;  %v182_v45 = vld [vmem:[#allocation7 + $0x18] sm:$0xff]  ;;  %v181_v46 = vld [vmem:[#allocation7 + $0x10] sm:$0xff] }
  0x1b   :  { %201 = vmatpush.msra.mxu2 %v192_v35  ;;  %v180_v47 = vld [vmem:[#allocation7 + $0x8] sm:$0xff]  ;;  %v179_v49 = vld [vmem:[#allocation7] sm:$0xff] }
  0x1c   :  { %114 = vmatpush.msra.mxu0 %v84_v10  ;;  %144 = vmatpush.msra.mxu1 %v129_v16  ;;  %v272_v48 = vld [vmem:[%s451_s3] ss:$0 sm:$0xff] }
  0x1d   :  { %202 = vmatpush.msra.mxu2 %v191_v36  ;;  %v273_v2 = vld [vmem:[%s453_s5] ss:$0 sm:$0xff]  ;;  %s245_s5 = sshll.u32 %s391_s15, 4  ;;  %s246_s5 = int_to_ptr.vmem [resolvable:$true] %s245_s5 }
  0x1e   :  { %145 = vmatpush.msra.mxu1 %v128_v17 }
  0x1f   :  { %203 = vmatpush.msra.mxu2 %v190_v37 }
  0x20   :  { %146 = vmatpush.msra.mxu1 %v127_v18 }
  0x21   :  { %204 = vmatpush.msra.mxu2 %v189_v38 }
  0x22   :  { %147 = vmatpush.msra.mxu1 %v126_v19 }
  0x23   :  { %205 = vmatpush.msra.mxu2 %v188_v39 }
  0x24   :  { %148 = vmatpush.msra.mxu1 %v125_v20 }
  0x25   :  { %206 = vmatpush.msra.mxu2 %v187_v40 }
  0x26   :  { %149 = vmatpush.msra.mxu1 %v124_v21 }
  0x27   :  { %207 = vmatpush.msra.mxu2 %v186_v41 }
  0x28   :  { %150 = vmatpush.msra.mxu1 %v123_v22 }
  0x29   :  { %208 = vmatpush.msra.mxu2 %v185_v42 }
  0x2a   :  { %151 = vmatpush.msra.mxu1 %v122_v24 }
  0x2b   :  { %209 = vmatpush.msra.mxu2 %v184_v43 }
  0x2c   :  { %152 = vmatpush.msra.mxu1 %v121_v25 }
  0x2d   :  { %210 = vmatpush.msra.mxu2 %v183_v44 }
  0x2e   :  { %153 = vmatpush.msra.mxu1 %v120_v27 }
  0x2f   :  { %211 = vmatpush.msra.mxu2 %v182_v45 }
  0x30   :  { %154 = vmatpush.msra.mxu1 %v119_v31 }
  0x31   :  { %212 = vmatpush.msra.mxu2 %v181_v46 }
  0x33   :  { %213 = vmatpush.msra.mxu2 %v180_v47 }
  0x35   :  { %214 = vmatpush.msra.mxu2 %v179_v49 }
  0x85   :  { %v80_v28 = vpop.permute.xlu0 %79 }
  0x86   :  { %vm81_vm4 = vcmp.eq.s32.totalorder %v77_v26, %v80_v28 }
  0x87   :  { %v258_v30 = vsel %vm81_vm4, 1.0, %v390_v29 }
  0x88   :  { %260 = vmatmul.msk.f32.vlgmr.msra.gmra.mxu0 %vm91_vm3, %v258_v30 }
 0x105   :  { %v116_v32 = vpop.f32.mrf.mxu0 }
 0x106   :  { %155 = vmatmul.f32.vlgmr.msra.gmra.mxu1 %v116_v32 }
 0x183   :  { %v156_v50 = vpop.f32.mrf.mxu1 }
 0x184   :  { %v157_v51 = vadd.f32 %v272_v48, %v156_v50 }
 0x186   :  { %v261_v52 = vmul.f32 -1.442695, %v157_v51 }
 0x188   :  { %274 = vpow2.f32 %v261_v52 }
 0x18e   :  { %v275_v53 = vpop.eup %274 }
 0x18f   :  { %v162_v54 = vadd.f32 1.0, %v275_v53 }
 0x191   :  { %276 = vrcp.f32 %v162_v54  ;;  %v174_v58 = vand.u32 2147483648, %v162_v54  ;;  %v172_v60 = vand.u32 2147483647, %v162_v54  ;;  %vm168_vm6 = vweird.f32 %v162_v54 }
 0x193   :  { %v175_v62 = vor.u32 1.1754944e-38, %v174_v58  ;;  %vm173_vm8 = vcmp.eq.f32.partialorder %v172_v60, 8.507059e+37 }
 0x197   :  { %v277_v55 = vpop.eup %276 }
 0x198   :  { %v164_v56 = vmul.f32 %v277_v55, %v162_v54  ;;  %vm169_vm5 = vweird.f32 %v277_v55 }
 0x199   :  { %vm170_vm7 = vmor %vm168_vm6, %vm169_vm5 }
 0x19a   :  { %v165_v57 = vsub.f32 1.0, %v164_v56 }
 0x19c   :  { %v166_v59 = vmul.f32 %v277_v55, %v165_v57 }
 0x19e   :  { %v167_v61 = vadd.f32 %v277_v55, %v166_v59 }
 0x1a0   :  { %v171_v63 = vsel %vm170_vm7, %v277_v55, %v167_v61 }
 0x1a1   :  { %v176_v0 = vsel %vm173_vm8, %v175_v62, %v171_v63 }
 0x1a2   :  { %v178_v1 = vmul.f32 %v176_v0, %v157_v51 }
 0x1a4   :  { %215 = vmatmul.f32.vlgmr.msra.gmra.mxu2 %v178_v1 }
 0x227   :  { %v216_v3 = vpop.f32.mrf.mxu2 }
 0x228   :  { %v217_v4 = vadd.f32 %v273_v2, %v216_v3 }
 0x22a   :  { %v262_v5 = vmul.f32 -1.442695, %v217_v4 }
 0x22c   :  { %278 = vpow2.f32 %v262_v5 }
 0x232   :  { %v279_v6 = vpop.eup %278 }
 0x233   :  { %v222_v7 = vadd.f32 1.0, %v279_v6 }
 0x235   :  { %280 = vrcp.f32 %v222_v7  ;;  %v234_v11 = vand.u32 2147483648, %v222_v7  ;;  %v232_v13 = vand.u32 2147483647, %v222_v7  ;;  %vm228_vm10 = vweird.f32 %v222_v7 }
 0x237   :  { %v235_v15 = vor.u32 1.1754944e-38, %v234_v11  ;;  %vm233_vm12 = vcmp.eq.f32.partialorder %v232_v13, 8.507059e+37 }
 0x23b   :  { %v281_v8 = vpop.eup %280 }
 0x23c   :  { %v224_v9 = vmul.f32 %v281_v8, %v222_v7  ;;  %vm229_vm9 = vweird.f32 %v281_v8 }
 0x23d   :  { %vm230_vm11 = vmor %vm228_vm10, %vm229_vm9 }
 0x23e   :  { %v225_v10 = vsub.f32 1.0, %v224_v9 }
 0x240   :  { %v226_v12 = vmul.f32 %v281_v8, %v225_v10 }
 0x242   :  { %v227_v14 = vadd.f32 %v281_v8, %v226_v12 }
 0x244   :  { %v231_v16 = vsel %vm230_vm11, %v281_v8, %v227_v14 }
 0x245   :  { %v236_v17 = vsel %vm233_vm12, %v235_v15, %v231_v16 }
 0x246   :  { %v238_v18 = vmul.f32 %v236_v17, %v217_v4 }
 0x248   :  { %239 = vst [vmem:[#allocation8] sm:$0xff] %v238_v18 }
 0x249   :  { %250 = dma.vmem_to_hbm [thread:$0]  %s246_s5, 128, %s248_s18, [#allocation4]  }
 0x24a   :  { %382 = dma.done.wait [#allocation4], 128  }
 0x24b   :  { %383 = vsyncadd [#allocation4], 4294967168 }
 0x24c   :  { %255 = vsyncpa [#allocation3], 1 }
 0x24d   :  { %256 = vsyncpa [#allocation6], 1 }
 0x24e   :  { %257 = vsyncpa [#allocation4], 1 }

</bundles_post_ra>
